<compile_context>
chip_gen: v6e
topology: v6e:2x2x1
jax: 0.10.0
libtpu: 0.0.40
codegen_flags: <defaults>
</compile_context>

<pallas_src>
import jax
import jax.numpy as jnp
from jax.experimental import pallas as pl
from jax.experimental.pallas import tpu as pltpu


def channel_attention_kernel(x_ref, beta_ref, o_ref):
    # x_ref:    (Bblk, C, HW) VMEM tile in the caller's dtype
    # beta_ref: (1, 1)        SMEM scalar parameter (f32)
    # o_ref:    (Bblk, C, HW) output tile in the caller's dtype
    x_in = x_ref[...]
    x_f32 = x_in.astype(jnp.float32)       # residual / epilogue path (f32)
    x_bf16 = x_in.astype(jnp.bfloat16)     # MXU operand path (bf16)

    # Gram over the spatial axis: gram[b, i, j] = sum_m x[b, i, m] * x[b, j, m].
    # Contraction K = HW (lane axis on both operands); bf16 in, f32 accumulate.
    gram = jax.lax.dot_general(
        x_bf16, x_bf16,
        dimension_numbers=(((2,), (2,)), ((0,), (0,))),
        preferred_element_type=jnp.float32)                    # (Bblk, C, C)

    # softmax(rowmax(gram) - gram) is shift-invariant and, with its own
    # stabilization, reduces to exp(rowmin(gram) - gram) / rowsum(...).
    e = jnp.exp(jnp.min(gram, axis=-1, keepdims=True) - gram)  # (Bblk, C, C) f32
    inv = pl.reciprocal(jnp.sum(e, axis=-1, keepdims=True), approx=True)
    attn = e * inv                                             # (Bblk, C, C) f32

    # feat_e = attention @ feat_a  -> (Bblk, C, HW); output stays lane-dense.
    feat_e = jax.lax.dot_general(
        attn.astype(jnp.bfloat16), x_bf16,
        dimension_numbers=(((2,), (1,)), ((0,), (0,))),
        preferred_element_type=jnp.float32)                    # (Bblk, C, HW)

    beta = beta_ref[0, 0]
    o_ref[...] = (beta * feat_e + x_f32).astype(o_ref.dtype)


def channel_attention_pallas(x_flat, beta_arr):
    """x_flat: (B, C, HW) any float dtype; beta_arr: (1, 1) f32.

    Returns (B, C, HW) in x_flat.dtype.
    """
    b, c, hw = x_flat.shape
    itemsize = jnp.dtype(x_flat.dtype).itemsize

    # Pick the largest batch block (dividing B) whose per-operand slab stays
    # inside a conservative budget -> big tiles at toy sizes, 1 image/step at
    # real DANet sizes.
    per_image_bytes = c * hw * itemsize
    budget_bytes = 8 * 1024 * 1024
    bblk = max(1, min(b, budget_bytes // max(per_image_bytes, 1)))
    while b % bblk:
        bblk -= 1
    grid = (b // bblk,)

    # Rough per-step VMEM need: double-buffered in/out blocks + in-kernel f32 /
    # bf16 temps + the (C, C) softmax matrices.  Capped at 64 MiB (valid on v7x
    # physical VMEM; v5e/v6e have 128 MiB).
    est = (4 * bblk * c * hw * itemsize        # 2x in + 2x out pipeline buffers
           + bblk * c * hw * (4 + 4 + 2)       # x_f32, feat_e (f32), x_bf16
           + 4 * bblk * c * c * 4)             # gram / e / attn (+ slack)
    vmem_limit = int(min(max(2 * est, 32 << 20), 64 << 20))

    return pl.pallas_call(
        channel_attention_kernel,
        out_shape=jax.ShapeDtypeStruct((b, c, hw), x_flat.dtype),
        grid_spec=pltpu.PrefetchScalarGridSpec(
            num_scalar_prefetch=0,
            grid=grid,
            in_specs=[
                # (Bblk, C, HW) slab: last two dims cover the full array extent,
                # so no (8,128) divisibility requirement; HW is lane-dense.
                pl.BlockSpec((bblk, c, hw), lambda i: (i, 0, 0)),
                # beta is a scalar learned parameter -> SMEM, passed untiled.
                pl.BlockSpec(memory_space=pltpu.MemorySpace.SMEM),
            ],
            out_specs=pl.BlockSpec((bblk, c, hw), lambda i: (i, 0, 0)),
        ),
        compiler_params=pltpu.CompilerParams(
            dimension_semantics=("parallel",),   # batch blocks are independent
            vmem_limit_bytes=vmem_limit,
        ),
    )(x_flat, beta_arr)


@jax.jit
def channel_attention_forward(x_nchw, beta):
    """PyTorch-equivalent forward: x (B, C, H, W), beta scalar parameter."""
    b, c, h, w = x_nchw.shape
    # No wrapper-side dtype cast: HBM I/O stays in x's dtype; the kernel
    # upcasts to f32 (and narrows MXU operands to bf16) inside VMEM.
    x_flat = x_nchw.reshape(b, c, h * w)
    beta_arr = jnp.reshape(beta, (1, 1)).astype(jnp.float32)
    out_flat = channel_attention_pallas(x_flat, beta_arr)
    return out_flat.reshape(b, c, h, w)


def reference_forward(x_nchw, beta):
    """Exact f32 reference (matches the PyTorch module)."""
    b, c, h, w = x_nchw.shape
    feat_a = x_nchw.reshape(b, c, h * w).astype(jnp.float32)
    attention = jnp.einsum('bcm,bdm->bcd', feat_a, feat_a)
    attention_new = jnp.max(attention, axis=-1, keepdims=True) - attention
    attention = jax.nn.softmax(attention_new, axis=-1)
    feat_e = jnp.einsum('bcd,bdm->bcm', attention, feat_a).reshape(b, c, h, w)
    return jnp.reshape(beta, (1, 1, 1, 1)).astype(jnp.float32) * feat_e + \
        x_nchw.astype(jnp.float32)


def reference_forward_mxu(x_nchw, beta):
    """Reference that mimics the kernel's MXU numerics: bf16 matmul operands,
    f32 accumulation, fused exp(rowmin - gram) softmax.  Only the kernel's
    approx reciprocal is not reproduced here."""
    b, c, h, w = x_nchw.shape
    feat_a = x_nchw.reshape(b, c, h * w).astype(jnp.float32)
    fa_bf = feat_a.astype(jnp.bfloat16)
    gram = jnp.einsum('bcm,bdm->bcd', fa_bf, fa_bf,
                      preferred_element_type=jnp.float32)
    e = jnp.exp(jnp.min(gram, axis=-1, keepdims=True) - gram)
    attn = e / jnp.sum(e, axis=-1, keepdims=True)
    feat_e = jnp.einsum('bcd,bdm->bcm', attn.astype(jnp.bfloat16), fa_bf,
                        preferred_element_type=jnp.float32)
    out = jnp.reshape(beta, (1, 1, 1)).astype(jnp.float32) * feat_e + feat_a
    return out.reshape(b, c, h, w)


if __name__ == "__main__":
    key = jax.random.PRNGKey(0)
    k_x, k_b = jax.random.split(key)

    B, C, H, W = 2, 4, 16, 16
    x = jax.random.normal(k_x, (B, C, H, W), jnp.float32)
    # PyTorch initializes beta to 0 (which makes out == x); use a nonzero value
    # so the attention path is actually exercised by the correctness check.
    beta = 0.5 + 0.1 * jax.random.normal(k_b, (1,), jnp.float32)

    out = channel_attention_forward(x, beta)
    out = jax.block_until_ready(out)
    assert out.shape == (B, C, H, W)
    assert out.dtype == x.dtype

    # Primary check: against a reference with the same MXU numerics (bf16
    # matmul operands, f32 accumulate); residual differences come only from the
    # approx reciprocal (~2^-12 rel) and its effect on the bf16 attn rounding.
    ref_mxu = reference_forward_mxu(x, beta)
    assert jnp.allclose(out, ref_mxu, atol=2e-2, rtol=2e-2), \
        "mismatch vs bf16-MXU-matched reference"

    # Sanity check: close to the exact f32 reference (bf16 gram perturbs the
    # softmax logits slightly, so the tolerance is loose by design).
    ref_f32 = reference_forward(x, beta)
    assert jnp.allclose(out, ref_f32, atol=2e-1, rtol=2e-1), \
        "mismatch vs exact f32 reference"

    print("KERNEL_OK")
</pallas_src>

<mosaic_0001>
module attributes {stable_mosaic.version = 11 : i64} {
  func.func @channel_attention_kernel(%arg0: i32, %arg1: memref<2x4x256xf32, #tpu.memory_space<vmem>>, %arg2: memref<1x1xf32, #tpu.memory_space<smem>>, %arg3: memref<2x4x256xf32, #tpu.memory_space<vmem>>) attributes {dimension_semantics = [#tpu.dimension_semantics<parallel>], iteration_bounds = array<i64: 1>, scalar_prefetch = 0 : i64, scratch_operands = 0 : i64, tpu.core_type = #tpu.core_type<tc>, window_params = [{transform_indices = @transform_0, window_bounds = array<i64: 2, 4, 256>}, {transform_indices = @transform_1, window_bounds = array<i64: 1, 1>}, {transform_indices = @transform_2, window_bounds = array<i64: 2, 4, 256>}]} {
    %c0 = arith.constant 0 : index
    %c0_0 = arith.constant 0 : index
    %c0_1 = arith.constant 0 : index
    %0 = vector.load %arg1[%c0, %c0_0, %c0_1] : memref<2x4x256xf32, #tpu.memory_space<vmem>>, vector<2x4x256xf32>
    %1 = arith.truncf %0 : vector<2x4x256xf32> to vector<2x4x256xbf16>
    %cst = arith.constant dense<0.000000e+00> : vector<2x4x4xf32>
    %2 = tpu.matmul %1, %1, %cst {dimension_numbers = #tpu.dot_dimension_numbers<[2], [2], [1], [1], [0, 0, 0, 1, 1, 1], [0], [0]>} : vector<2x4x256xbf16>, vector<2x4x256xbf16>, vector<2x4x4xf32> -> vector<2x4x4xf32>
    %cst_2 = arith.constant dense<0x7F800000> : vector<2x4xf32>
    %3 = vector.multi_reduction <minimumf>, %2, %cst_2 [2] : vector<2x4x4xf32> to vector<2x4xf32>
    %4 = vector.shape_cast %3 : vector<2x4xf32> to vector<2x4x1xf32>
    %5 = vector.broadcast %4 : vector<2x4x1xf32> to vector<2x4x4xf32>
    %6 = arith.subf %5, %2 : vector<2x4x4xf32>
    %7 = math.exp %6 : vector<2x4x4xf32>
    %cst_3 = arith.constant dense<0.000000e+00> : vector<2x4xf32>
    %8 = vector.multi_reduction <add>, %7, %cst_3 [2] : vector<2x4x4xf32> to vector<2x4xf32>
    %9 = vector.shape_cast %8 : vector<2x4xf32> to vector<2x4x1xf32>
    %10 = tpu.reciprocal %9 {approx = true} : vector<2x4x1xf32> -> vector<2x4x1xf32>
    %11 = vector.broadcast %10 : vector<2x4x1xf32> to vector<2x4x4xf32>
    %12 = arith.mulf %7, %11 : vector<2x4x4xf32>
    %13 = arith.truncf %12 : vector<2x4x4xf32> to vector<2x4x4xbf16>
    %cst_4 = arith.constant dense<0.000000e+00> : vector<2x4x256xf32>
    %14 = tpu.matmul %13, %1, %cst_4 {dimension_numbers = #tpu.dot_dimension_numbers<[2], [1], [1], [2], [0, 0, 0, 1, 1, 2], [0], [0]>} : vector<2x4x4xbf16>, vector<2x4x256xbf16>, vector<2x4x256xf32> -> vector<2x4x256xf32>
    %c0_5 = arith.constant 0 : index
    %c0_6 = arith.constant 0 : index
    %15 = memref.load %arg2[%c0_5, %c0_6] : memref<1x1xf32, #tpu.memory_space<smem>>
    %16 = vector.broadcast %15 : f32 to vector<2x4x256xf32>
    %17 = arith.mulf %16, %14 : vector<2x4x256xf32>
    %18 = arith.addf %17, %0 : vector<2x4x256xf32>
    %c0_7 = arith.constant 0 : index
    %c0_8 = arith.constant 0 : index
    %c0_9 = arith.constant 0 : index
    %19 = vector.load %arg3[%c0_7, %c0_8, %c0_9] : memref<2x4x256xf32, #tpu.memory_space<vmem>>, vector<2x4x256xf32>
    tpu.vector_store %arg3[%c0_7, %c0_8, %c0_9], %18 {strides = array<i32>} : memref<2x4x256xf32, #tpu.memory_space<vmem>>, vector<2x4x256xf32>,
    return
  }
  func.func @transform_0(%arg0: i32) -> (i32, i32, i32) {
    %c0_i32 = arith.constant 0 : i32
    %c0_i32_0 = arith.constant 0 : i32
    %c0_i32_1 = arith.constant 0 : i32
    return %arg0, %c0_i32, %c0_i32_0 : i32, i32, i32
  }
  func.func @transform_1(%arg0: i32) -> (i32, i32) {
    %c0_i32 = arith.constant 0 : i32
    %c0_i32_0 = arith.constant 0 : i32
    %c0_i32_1 = arith.constant 0 : i32
    return %c0_i32, %c0_i32_0 : i32, i32
  }
  func.func @transform_2(%arg0: i32) -> (i32, i32, i32) {
    %c0_i32 = arith.constant 0 : i32
    %c0_i32_0 = arith.constant 0 : i32
    %c0_i32_1 = arith.constant 0 : i32
    return %arg0, %c0_i32, %c0_i32_0 : i32, i32, i32
  }
}

</mosaic_0001>

<bundles_post_ra>
// kernel: channel_attention_forward.1
= control target key start
LH: loop header
LB: loop body
LE: loop exit
PB: predicated region body
PF: predicated region fallthrough
CT: control target
= control target key end

     0   :  { %vm105_vm0 = vcmask 27648   ;;  %vm134_vm1 = vcmask 1041408   ;;  %v271_v30 = vmov 0   ;;  %vm130_vm2 = vcmask 31744   ;;  %s330_s0 = inlined_call_operand.vmem [shape: f32[2,4,256], index: 0, kind: input, shape index: {}]   ;;  %s331_s1 = inlined_call_operand.<no memory space> [shape: f32[1,1], index: 1, kind: input, shape index: {}]   ;;  %s332_s2 = inlined_call_operand.vmem [shape: f32[2,4,256], index: 2, kind: output, shape index: {}]  }
   0x1   :  { %v290_v0 = vld [vmem:[%s330_s0] sm:$0xff]  ;;  %v295_v1 = vld [vmem:[%s330_s0 + $0x8] sm:$0xff]  ;;  %v233_v39 = vstv %s331_s1 }
   0x2   :  { %v299_v2 = vcombine.high %v290_v0, %v290_v0  ;;  %v303_v3 = vcombine.high %v295_v1, %v295_v1  ;;  %v21_v4 = vpack.c.bf16 %v290_v0, %v290_v0  ;;  %v23_v5 = vpack.c.bf16 %v295_v1, %v295_v1 }
   0x4   :  { %v22_v6 = vpack.c.bf16 %v299_v2, %v299_v2  ;;  %v24_v7 = vpack.c.bf16 %v303_v3, %v303_v3  ;;  %v136_v28 = vsel %vm134_vm1, %v21_v4, 0  ;;  %v186_v29 = vsel %vm134_vm1, %v23_v5, 0 }
   0x6   :  { %39 = vmatprep.subr.bf16.mxu0 %v22_v6  ;;  %79 = vmatprep.subr.bf16.mxu1 %v24_v7 }
   0x7   :  { %40 = vmatpush1.bf16.xpose.msra.mxu0 %v21_v4  ;;  %80 = vmatpush1.bf16.xpose.msra.mxu1 %v23_v5 }
   0x8   :  { %57 = vmatprep.mubr.bf16.mxu0 %v22_v6  ;;  %97 = vmatprep.mubr.bf16.mxu1 %v24_v7 }
   0x9   :  { %256 = vmatprep.subr.msk.bf16.mxu0 %vm134_vm1, %v22_v6  ;;  %258 = vmatprep.subr.msk.bf16.mxu1 %vm134_vm1, %v24_v7 }
   0xe   :  { %58 = vmatmul.mubr.bf16.vlgmr.msra.gmra.mxu0 %v21_v4  ;;  %98 = vmatmul.mubr.bf16.vlgmr.msra.gmra.mxu1 %v23_v5 }
   0xf   :  { %156 = vmatpush1.bf16.msra.mxu0 %v136_v28  ;;  %206 = vmatpush1.bf16.msra.mxu1 %v186_v29 }
  0x10   :  { %173 = vmatprep.mubr.bf16.mxu0 %v271_v30  ;;  %223 = vmatprep.mubr.bf16.mxu1 %v271_v30 }
  0xce   :  { %v59_v8 = vpop.f32.mrf.mxu0  ;;  %v99_v9 = vpop.f32.mrf.mxu1 }
  0xcf   :  { %v106_v10 = vsel %vm105_vm0, %v59_v8, inf  ;;  %v109_v13 = vsel %vm105_vm0, %v99_v9, inf }
  0xd0   :  { %v101_v11 = vpop.f32.mrf.mxu1  ;;  %107 = vmin.xlane.f32.xlu0 %v106_v10  ;;  %v61_v12 = vpop.f32.mrf.mxu0 }
  0xd2   :  { %v62_v14 = vpop.f32.mrf.mxu0  ;;  %v102_v15 = vpop.f32.mrf.mxu1 }
  0xd4   :  { %v103_v16 = vpop.f32.mrf.mxu1  ;;  %110 = vmin.xlane.f32.xlu0 %v109_v13  ;;  %v63_v17 = vpop.f32.mrf.mxu0 }
 0x159   :  { %v108_v18 = vpop.xlane.xlu0 %107 }
 0x15a   :  { %v112_v19 = vsub.f32 %v108_v18, %v59_v8 }
 0x15c   :  { %v114_v20 = vmul.f32 1.442695, %v112_v19 }
 0x15d   :  { %v111_v21 = vpop.xlane.xlu0 %110 }
 0x15e   :  { %263 = vpow2.f32 %v114_v20  ;;  %v113_v22 = vsub.f32 %v111_v21, %v99_v9 }
 0x160   :  { %v116_v23 = vmul.f32 1.442695, %v113_v22 }
 0x162   :  { %265 = vpow2.f32 %v116_v23 }
 0x16b   :  { %v264_v24 = vpop.eup %263 }
 0x16c   :  { %v118_v25 = vsel %vm105_vm0, %v264_v24, 0.0 }
 0x16d   :  { %119 = vadd.xlane.f32.xlu1 %v118_v25 }
 0x16f   :  { %v266_v26 = vpop.eup %265 }
 0x170   :  { %v121_v27 = vsel %vm105_vm0, %v266_v26, 0.0 }
 0x171   :  { %122 = vadd.xlane.f32.xlu1 %v121_v27 }
 0x1f6   :  { %v120_v31 = vpop.xlane.xlu1 %119 }
 0x1f7   :  { %267 = vrcp.f32 %v120_v31 }
 0x1fa   :  { %v123_v32 = vpop.xlane.xlu1 %122 }
 0x1fb   :  { %269 = vrcp.f32 %v123_v32 }
 0x204   :  { %v268_v33 = vpop.eup %267 }
 0x205   :  { %v126_v34 = vmul.f32 %v268_v33, %v264_v24 }
 0x207   :  { %v128_v35 = vpack.c.bf16 %v126_v34, %v126_v34 }
 0x208   :  { %v270_v36 = vpop.eup %269 }
 0x209   :  { %257 = vmatmul.mubr.msk.bf16.vlgmr.msra.gmra.mxu0 %vm130_vm2, %v128_v35  ;;  %v127_v37 = vmul.f32 %v270_v36, %v266_v26 }
 0x20b   :  { %v129_v38 = vpack.c.bf16 %v127_v37, %v127_v37 }
 0x20d   :  { %259 = vmatmul.mubr.msk.bf16.vlgmr.msra.gmra.mxu1 %vm130_vm2, %v129_v38 }
 0x2c9   :  { %v175_v40 = vpop.f32.mrf.mxu0 }
 0x2ca   :  { %v234_v41 = vmul.f32 %v233_v39, %v175_v40 }
 0x2cb   :  { %v177_v42 = vpop.f32.mrf.mxu0 }
 0x2cc   :  { %v235_v43 = vmul.f32 %v233_v39, %v177_v42  ;;  %v238_v46 = vadd.f32 %v234_v41, %v290_v0 }
 0x2cd   :  { %v179_v44 = vpop.f32.mrf.mxu0  ;;  %v225_v45 = vpop.f32.mrf.mxu1 }
 0x2ce   :  { %v239_v47 = vadd.f32 %v235_v43, %v299_v2  ;;  %v236_v48 = vmul.f32 %v233_v39, %v225_v45 }
 0x2cf   :  { %v180_v49 = vpop.f32.mrf.mxu0  ;;  %v227_v50 = vpop.f32.mrf.mxu1 }
 0x2d0   :  { %v246_v51 = vcombine.low %v238_v46, %v239_v47  ;;  %v237_v52 = vmul.f32 %v233_v39, %v227_v50  ;;  %v240_v54 = vadd.f32 %v236_v48, %v295_v1 }
 0x2d1   :  { %v229_v53 = vpop.f32.mrf.mxu1 }
 0x2d2   :  { %250 = vst [vmem:[%s332_s2] sm:$0xff] %v246_v51  ;;  %v241_v55 = vadd.f32 %v237_v52, %v303_v3 }
 0x2d3   :  { %v230_v56 = vpop.f32.mrf.mxu1 }
 0x2d4   :  { %v247_v57 = vcombine.low %v240_v54, %v241_v55 }
 0x2d6   :  { %251 = vst [vmem:[%s332_s2 + $0x8] sm:$0xff] %v247_v57 }

</bundles_post_ra>
